<compile_context>
chip_gen: v7x
topology: tpu7x:2x2x1
jax: 0.10.0
libtpu: 0.0.40
codegen_flags: <defaults>
</compile_context>

<pallas_src>
import functools

import jax
import jax.numpy as jnp
import numpy as np
from jax import lax
from jax.experimental import pallas as pl
from jax.experimental.pallas import tpu as pltpu

N_CLASSES = 6
EPS = 1e-7

NUM_SPLITS = 2            # leading "parallel" grid axis (v7x: 2 TensorCores / chip)
CHUNK = 512               # examples per in-kernel streaming chunk (4 vregs / array)
MAX_CHUNKS_PER_TILE = 128 # 128 * 512 = 64K rows per grid step (~2 MiB block, dbl-buffered)
LANES = 128


def _cdiv(a, b):
    return -(-a // b)


def _qwk_kernel(n_valid, cpt, tiles_per_split,
                aug_ref, out_ref, p_acc, h_acc, n_acc):
    """Stream one tile of `cpt` chunks; accumulate per-split moments."""
    s = pl.program_id(0)          # split index ("parallel")
    j = pl.program_id(1)          # tile index within split ("arbitrary" reduction)

    @pl.when(j == 0)
    def _init():
        p_acc[...] = jnp.zeros_like(p_acc)
        h_acc[...] = jnp.zeros_like(h_acc)
        n_acc[...] = jnp.zeros_like(n_acc)

    # Loop-invariant iotas, hoisted (JAX does not CSE broadcast_in_dim).
    lane = lax.broadcasted_iota(jnp.int32, (1, CHUNK), 1)
    clsf = lax.broadcasted_iota(jnp.int32, (N_CLASSES, CHUNK), 0).astype(jnp.float32)
    tile_base = (s * tiles_per_split + j) * (cpt * CHUNK)

    def chunk_body(i, carry):
        psum, hsum, nsum = carry
        blk = aug_ref[i]                                      # (C+1, CHUNK), native dtype
        x = blk[:N_CLASSES, :].astype(jnp.float32)            # (C, CHUNK) logits
        tgtf = blk[N_CLASSES:N_CLASSES + 1, :].astype(jnp.float32)  # (1, CHUNK) class ids
        maskf = ((tile_base + i * CHUNK + lane) < n_valid).astype(jnp.float32)

        # Numerically-stable softmax over the class (sublane) axis.
        m = jnp.max(x, axis=0, keepdims=True)                 # (1, CHUNK)
        e = jnp.exp(x - m)                                    # (C, CHUNK)  (EUP)
        denom = jnp.sum(e, axis=0, keepdims=True)             # >= 1 (padded lanes: C)
        p = e * (maskf / denom)                               # exact divide; masked probs

        # One-hot(target) and (class - target), computed without a one-hot matmul.
        # (targets are small exact integers in float, so == is exact.)
        onehot = jnp.where(clsf == tgtf, maskf, 0.0)
        d = clsf - tgtf
        return psum + p, hsum + onehot, nsum + d * d * p

    z = jnp.zeros((N_CLASSES, CHUNK), jnp.float32)
    psum, hsum, nsum = lax.fori_loop(0, cpt, chunk_body, (z, z, z))

    # Single lane-reduction per tile, then a one-vreg RMW of each accumulator.
    p_acc[...] += jnp.sum(psum, axis=1, keepdims=True)        # -> hist_pred (C, 1)
    h_acc[...] += jnp.sum(hsum, axis=1, keepdims=True)        # -> hist_true (C, 1)
    n_acc[...] += jnp.sum(nsum, axis=1, keepdims=True)        # -> (C-1)^2 * sum(W*conf)

    @pl.when(j == pl.num_programs(1) - 1)
    def _finalize():
        w = (lax.broadcasted_iota(jnp.int32, (N_CLASSES, 1), 0).astype(jnp.float32)
             * (1.0 / (N_CLASSES - 1)))                       # (C, 1) class weights
        hp = p_acc[...]
        ht = h_acc[...]
        num = jnp.sum(n_acc[...]) * (1.0 / float((N_CLASSES - 1) ** 2))
        moments = [num,
                   jnp.sum(hp), jnp.sum(w * hp), jnp.sum(w * w * hp),
                   jnp.sum(ht), jnp.sum(w * ht), jnp.sum(w * w * ht)]
        lane_out = lax.broadcasted_iota(jnp.int32, (1, 1, LANES), 2)
        vals = jnp.zeros((1, 1, LANES), jnp.float32)
        for k, v in enumerate(moments):
            vals = jnp.where(lane_out == k, v, vals)
        out_ref[...] = vals


def qwk_metric(logits, target, *, max_chunks_per_tile=MAX_CHUNKS_PER_TILE):
    """QWKMetric(binned=False).forward(logits, target) -> scalar (float32)."""
    N, C = logits.shape
    assert C == N_CLASSES
    dt = logits.dtype

    # Chunk / tile geometry.
    per_split = _cdiv(N, NUM_SPLITS)
    chunks_per_split = max(1, _cdiv(per_split, CHUNK))
    cpt = min(max_chunks_per_tile, chunks_per_split)          # chunks per grid step
    tiles_per_split = _cdiv(chunks_per_split, cpt)
    n_chunks = NUM_SPLITS * tiles_per_split * cpt
    n_pad = n_chunks * CHUNK

    # Single lane-dense input stream in the logits' native dtype:
    # rows 0..5 = class-major logits, row 6 = target class id.  Zero padding of
    # the overhang rows keeps exp() finite in masked lanes.
    x = jnp.pad(logits, ((0, n_pad - N), (0, 0)))             # (n_pad, C)
    x = jnp.transpose(x.reshape(n_chunks, CHUNK, C), (0, 2, 1))  # (n_chunks, C, CHUNK)
    tgt = target.reshape(-1).astype(dt)
    tgt = jnp.pad(tgt, (0, n_pad - N)).reshape(n_chunks, 1, CHUNK)
    aug = jnp.concatenate([x, tgt], axis=1)                   # (n_chunks, C+1, CHUNK)

    kernel = functools.partial(_qwk_kernel, N, cpt, tiles_per_split)

    parts = pl.pallas_call(
        kernel,
        out_shape=jax.ShapeDtypeStruct((NUM_SPLITS, 1, LANES), jnp.float32),
        grid=(NUM_SPLITS, tiles_per_split),
        in_specs=[
            pl.BlockSpec((cpt, N_CLASSES + 1, CHUNK),
                         lambda s, j: (s * tiles_per_split + j, 0, 0)),
        ],
        out_specs=pl.BlockSpec((1, 1, LANES), lambda s, j: (s, 0, 0)),
        scratch_shapes=[pltpu.VMEM((N_CLASSES, 1), jnp.float32)] * 3,
        compiler_params=pltpu.CompilerParams(
            dimension_semantics=("parallel", "arbitrary")),
    )(aug)

    # Combine the per-split moments (tiny scalar math in plain JAX).
    tot = jnp.sum(parts[:, 0, :7], axis=0)
    num, p0, p1, p2, t0, t1, t2 = (tot[k] for k in range(7))
    # sum(W * E) with E = ht hp^T / C.sum(); C.sum() == sum(hp) == p0.
    den = (t2 * p0 - 2.0 * t1 * p1 + t0 * p2) / p0
    return 1.0 - num / (den + EPS)


def qwk_reference(logits, target):
    """Pure-JAX mirror of the PyTorch module, for validation."""
    p = jax.nn.softmax(logits.astype(jnp.float32), axis=1)
    t = jax.nn.one_hot(target.reshape(-1), N_CLASSES, dtype=jnp.float32)
    conf = jnp.einsum("nb,na->ab", p, t, precision=jax.lax.Precision.HIGHEST)
    ht = t.sum(0)[:, None]
    hp = p.sum(0)[:, None]
    E = (ht @ hp.T) / conf.sum()
    w = jnp.arange(N_CLASSES, dtype=jnp.float32) / (N_CLASSES - 1)
    W = (w[None, :] - w[:, None]) ** 2
    return 1.0 - (W * conf).sum() / ((W * E).sum() + EPS)


if __name__ == "__main__":
    key = jax.random.PRNGKey(0)
    k1, k2, k3, k4, k5, k6 = jax.random.split(key, 6)

    # Small demo shape (module interface: logits (N, 6), target class indices).
    N = 8
    logits = jax.random.normal(k1, (N, N_CLASSES), dtype=jnp.float32)
    target = jax.random.randint(k2, (N, 1), 0, N_CLASSES, dtype=jnp.int32)
    qwk = qwk_metric(logits, target)
    jax.block_until_ready(qwk)
    ref = qwk_reference(logits, target)
    np.testing.assert_allclose(np.asarray(qwk), np.asarray(ref), rtol=1e-4, atol=1e-5)

    # Exercise row masking in both splits (N not a multiple of the chunk size).
    N2 = 257
    logits2 = jax.random.normal(k3, (N2, N_CLASSES), dtype=jnp.float32)
    target2 = jax.random.randint(k4, (N2,), 0, N_CLASSES, dtype=jnp.int32)
    qwk2 = qwk_metric(logits2, target2)
    jax.block_until_ready(qwk2)
    np.testing.assert_allclose(np.asarray(qwk2), np.asarray(qwk_reference(logits2, target2)),
                               rtol=1e-4, atol=1e-5)

    # Exercise both the multi-chunk fori path (default) and the multi-tile
    # grid-accumulation path (max_chunks_per_tile=1).
    N3 = 2000
    logits3 = jax.random.normal(k5, (N3, N_CLASSES), dtype=jnp.float32)
    target3 = jax.random.randint(k6, (N3,), 0, N_CLASSES, dtype=jnp.int32)
    ref3 = qwk_reference(logits3, target3)
    qwk3a = qwk_metric(logits3, target3)                       # 1 tile/split, 2 chunks
    jax.block_until_ready(qwk3a)
    np.testing.assert_allclose(np.asarray(qwk3a), np.asarray(ref3), rtol=1e-4, atol=1e-5)
    qwk3b = qwk_metric(logits3, target3, max_chunks_per_tile=1)  # 2 tiles/split
    jax.block_until_ready(qwk3b)
    np.testing.assert_allclose(np.asarray(qwk3b), np.asarray(ref3), rtol=1e-4, atol=1e-5)

    print("KERNEL_OK")
</pallas_src>

<mosaic_0001>
module attributes {stable_mosaic.version = 11 : i64} {
  func.func @_qwk_kernel(%arg0: i32, %arg1: i32, %arg2: memref<1x7x512xf32, #tpu.memory_space<vmem>>, %arg3: memref<1x1x128xf32, #tpu.memory_space<vmem>>, %arg4: memref<6x1xf32, #tpu.memory_space<vmem>>, %arg5: memref<6x1xf32, #tpu.memory_space<vmem>>, %arg6: memref<6x1xf32, #tpu.memory_space<vmem>>) attributes {dimension_semantics = [#tpu.dimension_semantics<parallel>, #tpu.dimension_semantics<arbitrary>], iteration_bounds = array<i64: 2, 1>, scalar_prefetch = 0 : i64, scratch_operands = 3 : i64, tpu.core_type = #tpu.core_type<tc>, window_params = [{transform_indices = @transform_0, window_bounds = array<i64: 1, 7, 512>}, {transform_indices = @transform_1, window_bounds = array<i64: 1, 1, 128>}]} {
    %c0_i32 = arith.constant 0 : i32
    %0 = arith.cmpi eq, %arg1, %c0_i32 : i32
    %1 = arith.extui %0 : i1 to i32
    %c0_i32_0 = arith.constant 0 : i32
    %2 = arith.cmpi ne, %1, %c0_i32_0 : i32
    scf.if %2 {
      %cst_25 = arith.constant 0.000000e+00 : f32
      %64 = vector.broadcast %cst_25 : f32 to vector<6x1xf32>
      %c0_26 = arith.constant 0 : index
      %c0_27 = arith.constant 0 : index
      %65 = vector.load %arg4[%c0_26, %c0_27] : memref<6x1xf32, #tpu.memory_space<vmem>>, vector<6x1xf32>
      tpu.vector_store %arg4[%c0_26, %c0_27], %64 {strides = array<i32>} : memref<6x1xf32, #tpu.memory_space<vmem>>, vector<6x1xf32>,
      %cst_28 = arith.constant 0.000000e+00 : f32
      %66 = vector.broadcast %cst_28 : f32 to vector<6x1xf32>
      %c0_29 = arith.constant 0 : index
      %c0_30 = arith.constant 0 : index
      %67 = vector.load %arg5[%c0_29, %c0_30] : memref<6x1xf32, #tpu.memory_space<vmem>>, vector<6x1xf32>
      tpu.vector_store %arg5[%c0_29, %c0_30], %66 {strides = array<i32>} : memref<6x1xf32, #tpu.memory_space<vmem>>, vector<6x1xf32>,
      %cst_31 = arith.constant 0.000000e+00 : f32
      %68 = vector.broadcast %cst_31 : f32 to vector<6x1xf32>
      %c0_32 = arith.constant 0 : index
      %c0_33 = arith.constant 0 : index
      %69 = vector.load %arg6[%c0_32, %c0_33] : memref<6x1xf32, #tpu.memory_space<vmem>>, vector<6x1xf32>
      tpu.vector_store %arg6[%c0_32, %c0_33], %68 {strides = array<i32>} : memref<6x1xf32, #tpu.memory_space<vmem>>, vector<6x1xf32>,
    } else {
    }
    %3 = tpu.iota {dimensions = array<i32: 1>} : vector<1x512xi32>
    %4 = tpu.iota {dimensions = array<i32: 0>} : vector<6x512xi32>
    %5 = arith.sitofp %4 : vector<6x512xi32> to vector<6x512xf32>
    %c1_i32 = arith.constant 1 : i32
    %6 = arith.muli %arg0, %c1_i32 : i32
    %7 = arith.addi %6, %arg1 : i32
    %c512_i32 = arith.constant 512 : i32
    %8 = arith.muli %7, %c512_i32 : i32
    %cst = arith.constant 0.000000e+00 : f32
    %9 = vector.broadcast %cst : f32 to vector<6x512xf32>
    %c0_i32_1 = arith.constant 0 : i32
    %10 = arith.index_cast %c0_i32_1 : i32 to index
    %c0 = arith.constant 0 : index
    %c0_2 = arith.constant 0 : index
    %11 = vector.load %arg2[%10, %c0, %c0_2] : memref<1x7x512xf32, #tpu.memory_space<vmem>>, vector<1x7x512xf32>
    %12 = vector.shape_cast %11 : vector<1x7x512xf32> to vector<7x512xf32>
    %13 = vector.extract_strided_slice %12 {offsets = [0, 0], sizes = [6, 512], strides = [1, 1]} : vector<7x512xf32> to vector<6x512xf32>
    %14 = vector.extract_strided_slice %12 {offsets = [6, 0], sizes = [1, 512], strides = [1, 1]} : vector<7x512xf32> to vector<1x512xf32>
    %c512_i32_3 = arith.constant 512 : i32
    %15 = arith.muli %c0_i32_1, %c512_i32_3 : i32
    %16 = arith.addi %8, %15 : i32
    %17 = vector.broadcast %16 : i32 to vector<1x512xi32>
    %18 = arith.addi %17, %3 : vector<1x512xi32>
    %c8_i32 = arith.constant 8 : i32
    %19 = vector.broadcast %c8_i32 : i32 to vector<1x512xi32>
    %20 = arith.cmpi slt, %18, %19 : vector<1x512xi32>
    %21 = arith.extui %20 : vector<1x512xi1> to vector<1x512xi32>
    %22 = arith.sitofp %21 : vector<1x512xi32> to vector<1x512xf32>
    %cst_4 = arith.constant dense<0xFF800000> : vector<512xf32>
    %23 = vector.multi_reduction <maximumf>, %13, %cst_4 [0] : vector<6x512xf32> to vector<512xf32>
    %24 = vector.shape_cast %23 : vector<512xf32> to vector<1x512xf32>
    %25 = vector.broadcast %24 : vector<1x512xf32> to vector<6x512xf32>
    %26 = arith.subf %13, %25 : vector<6x512xf32>
    %27 = math.exp %26 : vector<6x512xf32>
    %cst_5 = arith.constant dense<0.000000e+00> : vector<512xf32>
    %28 = vector.multi_reduction <add>, %27, %cst_5 [0] : vector<6x512xf32> to vector<512xf32>
    %29 = vector.shape_cast %28 : vector<512xf32> to vector<1x512xf32>
    %30 = arith.divf %22, %29 : vector<1x512xf32>
    %31 = vector.broadcast %30 : vector<1x512xf32> to vector<6x512xf32>
    %32 = arith.mulf %27, %31 : vector<6x512xf32>
    %33 = vector.broadcast %14 : vector<1x512xf32> to vector<6x512xf32>
    %34 = arith.cmpf oeq, %5, %33 : vector<6x512xf32>
    %cst_6 = arith.constant 0.000000e+00 : f32
    %35 = vector.shape_cast %22 : vector<1x512xf32> to vector<1x512xf32>
    %36 = vector.broadcast %35 : vector<1x512xf32> to vector<6x512xf32>
    %37 = vector.broadcast %cst_6 : f32 to vector<6x512xf32>
    %38 = arith.select %34, %36, %37 : vector<6x512xi1>, vector<6x512xf32>
    %39 = vector.broadcast %14 : vector<1x512xf32> to vector<6x512xf32>
    %40 = arith.subf %5, %39 : vector<6x512xf32>
    %41 = arith.addf %9, %32 : vector<6x512xf32>
    %42 = arith.addf %9, %38 : vector<6x512xf32>
    %43 = arith.mulf %40, %40 : vector<6x512xf32>
    %44 = arith.mulf %43, %32 : vector<6x512xf32>
    %45 = arith.addf %9, %44 : vector<6x512xf32>
    %c1_i32_7 = arith.constant 1 : i32
    %c0_8 = arith.constant 0 : index
    %c0_9 = arith.constant 0 : index
    %46 = vector.load %arg4[%c0_8, %c0_9] : memref<6x1xf32, #tpu.memory_space<vmem>>, vector<6x1xf32>
    %cst_10 = arith.constant dense<0.000000e+00> : vector<6xf32>
    %47 = vector.multi_reduction <add>, %41, %cst_10 [1] : vector<6x512xf32> to vector<6xf32>
    %48 = vector.shape_cast %47 : vector<6xf32> to vector<6x1xf32>
    %49 = arith.addf %46, %48 : vector<6x1xf32>
    %c0_11 = arith.constant 0 : index
    %c0_12 = arith.constant 0 : index
    %50 = vector.load %arg4[%c0_11, %c0_12] : memref<6x1xf32, #tpu.memory_space<vmem>>, vector<6x1xf32>
    tpu.vector_store %arg4[%c0_11, %c0_12], %49 {strides = array<i32>} : memref<6x1xf32, #tpu.memory_space<vmem>>, vector<6x1xf32>,
    %c0_13 = arith.constant 0 : index
    %c0_14 = arith.constant 0 : index
    %51 = vector.load %arg5[%c0_13, %c0_14] : memref<6x1xf32, #tpu.memory_space<vmem>>, vector<6x1xf32>
    %cst_15 = arith.constant dense<0.000000e+00> : vector<6xf32>
    %52 = vector.multi_reduction <add>, %42, %cst_15 [1] : vector<6x512xf32> to vector<6xf32>
    %53 = vector.shape_cast %52 : vector<6xf32> to vector<6x1xf32>
    %54 = arith.addf %51, %53 : vector<6x1xf32>
    %c0_16 = arith.constant 0 : index
    %c0_17 = arith.constant 0 : index
    %55 = vector.load %arg5[%c0_16, %c0_17] : memref<6x1xf32, #tpu.memory_space<vmem>>, vector<6x1xf32>
    tpu.vector_store %arg5[%c0_16, %c0_17], %54 {strides = array<i32>} : memref<6x1xf32, #tpu.memory_space<vmem>>, vector<6x1xf32>,
    %c0_18 = arith.constant 0 : index
    %c0_19 = arith.constant 0 : index
    %56 = vector.load %arg6[%c0_18, %c0_19] : memref<6x1xf32, #tpu.memory_space<vmem>>, vector<6x1xf32>
    %cst_20 = arith.constant dense<0.000000e+00> : vector<6xf32>
    %57 = vector.multi_reduction <add>, %45, %cst_20 [1] : vector<6x512xf32> to vector<6xf32>
    %58 = vector.shape_cast %57 : vector<6xf32> to vector<6x1xf32>
    %59 = arith.addf %56, %58 : vector<6x1xf32>
    %c0_21 = arith.constant 0 : index
    %c0_22 = arith.constant 0 : index
    %60 = vector.load %arg6[%c0_21, %c0_22] : memref<6x1xf32, #tpu.memory_space<vmem>>, vector<6x1xf32>
    tpu.vector_store %arg6[%c0_21, %c0_22], %59 {strides = array<i32>} : memref<6x1xf32, #tpu.memory_space<vmem>>, vector<6x1xf32>,
    %c0_i32_23 = arith.constant 0 : i32
    %61 = arith.cmpi eq, %arg1, %c0_i32_23 : i32
    %62 = arith.extui %61 : i1 to i32
    %c0_i32_24 = arith.constant 0 : i32
    %63 = arith.cmpi ne, %62, %c0_i32_24 : i32
    scf.if %63 {
      %64 = tpu.iota {dimensions = array<i32: 0>} : vector<6x1xi32>
      %65 = arith.sitofp %64 : vector<6x1xi32> to vector<6x1xf32>
      %cst_25 = arith.constant 2.000000e-01 : f32
      %66 = vector.broadcast %cst_25 : f32 to vector<6x1xf32>
      %67 = arith.mulf %65, %66 : vector<6x1xf32>
      %c0_26 = arith.constant 0 : index
      %c0_27 = arith.constant 0 : index
      %68 = vector.load %arg4[%c0_26, %c0_27] : memref<6x1xf32, #tpu.memory_space<vmem>>, vector<6x1xf32>
      %c0_28 = arith.constant 0 : index
      %c0_29 = arith.constant 0 : index
      %69 = vector.load %arg5[%c0_28, %c0_29] : memref<6x1xf32, #tpu.memory_space<vmem>>, vector<6x1xf32>
      %c0_30 = arith.constant 0 : index
      %c0_31 = arith.constant 0 : index
      %70 = vector.load %arg6[%c0_30, %c0_31] : memref<6x1xf32, #tpu.memory_space<vmem>>, vector<6x1xf32>
      %71 = vector.shape_cast %70 : vector<6x1xf32> to vector<1x6x1xf32>
      %cst_32 = arith.constant dense<0.000000e+00> : vector<1xf32>
      %72 = vector.multi_reduction <add>, %71, %cst_32 [1, 2] : vector<1x6x1xf32> to vector<1xf32>
      %73 = vector.shape_cast %72 : vector<1xf32> to vector<1x1x1xf32>
      %74 = vector.extract %73[0, 0, 0] : f32 from vector<1x1x1xf32>
      %cst_33 = arith.constant 4.000000e-02 : f32
      %75 = arith.mulf %74, %cst_33 : f32
      %76 = vector.shape_cast %68 : vector<6x1xf32> to vector<1x6x1xf32>
      %cst_34 = arith.constant dense<0.000000e+00> : vector<1xf32>
      %77 = vector.multi_reduction <add>, %76, %cst_34 [1, 2] : vector<1x6x1xf32> to vector<1xf32>
      %78 = vector.shape_cast %77 : vector<1xf32> to vector<1x1x1xf32>
      %79 = vector.extract %78[0, 0, 0] : f32 from vector<1x1x1xf32>
      %80 = arith.mulf %67, %68 : vector<6x1xf32>
      %81 = vector.shape_cast %80 : vector<6x1xf32> to vector<1x6x1xf32>
      %cst_35 = arith.constant dense<0.000000e+00> : vector<1xf32>
      %82 = vector.multi_reduction <add>, %81, %cst_35 [1, 2] : vector<1x6x1xf32> to vector<1xf32>
      %83 = vector.shape_cast %82 : vector<1xf32> to vector<1x1x1xf32>
      %84 = vector.extract %83[0, 0, 0] : f32 from vector<1x1x1xf32>
      %85 = arith.mulf %67, %67 : vector<6x1xf32>
      %86 = arith.mulf %85, %68 : vector<6x1xf32>
      %87 = vector.shape_cast %86 : vector<6x1xf32> to vector<1x6x1xf32>
      %cst_36 = arith.constant dense<0.000000e+00> : vector<1xf32>
      %88 = vector.multi_reduction <add>, %87, %cst_36 [1, 2] : vector<1x6x1xf32> to vector<1xf32>
      %89 = vector.shape_cast %88 : vector<1xf32> to vector<1x1x1xf32>
      %90 = vector.extract %89[0, 0, 0] : f32 from vector<1x1x1xf32>
      %91 = vector.shape_cast %69 : vector<6x1xf32> to vector<1x6x1xf32>
      %cst_37 = arith.constant dense<0.000000e+00> : vector<1xf32>
      %92 = vector.multi_reduction <add>, %91, %cst_37 [1, 2] : vector<1x6x1xf32> to vector<1xf32>
      %93 = vector.shape_cast %92 : vector<1xf32> to vector<1x1x1xf32>
      %94 = vector.extract %93[0, 0, 0] : f32 from vector<1x1x1xf32>
      %95 = arith.mulf %67, %69 : vector<6x1xf32>
      %96 = vector.shape_cast %95 : vector<6x1xf32> to vector<1x6x1xf32>
      %cst_38 = arith.constant dense<0.000000e+00> : vector<1xf32>
      %97 = vector.multi_reduction <add>, %96, %cst_38 [1, 2] : vector<1x6x1xf32> to vector<1xf32>
      %98 = vector.shape_cast %97 : vector<1xf32> to vector<1x1x1xf32>
      %99 = vector.extract %98[0, 0, 0] : f32 from vector<1x1x1xf32>
      %100 = arith.mulf %67, %67 : vector<6x1xf32>
      %101 = arith.mulf %100, %69 : vector<6x1xf32>
      %102 = vector.shape_cast %101 : vector<6x1xf32> to vector<1x6x1xf32>
      %cst_39 = arith.constant dense<0.000000e+00> : vector<1xf32>
      %103 = vector.multi_reduction <add>, %102, %cst_39 [1, 2] : vector<1x6x1xf32> to vector<1xf32>
      %104 = vector.shape_cast %103 : vector<1xf32> to vector<1x1x1xf32>
      %105 = vector.extract %104[0, 0, 0] : f32 from vector<1x1x1xf32>
      %106 = tpu.iota {dimensions = array<i32: 2>} : vector<1x1x128xi32>
      %cst_40 = arith.constant 0.000000e+00 : f32
      %107 = vector.broadcast %cst_40 : f32 to vector<1x1x128xf32>
      %c0_i32_41 = arith.constant 0 : i32
      %108 = vector.broadcast %c0_i32_41 : i32 to vector<1x1x128xi32>
      %109 = arith.cmpi eq, %106, %108 : vector<1x1x128xi32>
      %110 = vector.broadcast %75 : f32 to vector<1x1x128xf32>
      %111 = arith.select %109, %110, %107 : vector<1x1x128xi1>, vector<1x1x128xf32>
      %c1_i32_42 = arith.constant 1 : i32
      %112 = vector.broadcast %c1_i32_42 : i32 to vector<1x1x128xi32>
      %113 = arith.cmpi eq, %106, %112 : vector<1x1x128xi32>
      %114 = vector.broadcast %79 : f32 to vector<1x1x128xf32>
      %115 = arith.select %113, %114, %111 : vector<1x1x128xi1>, vector<1x1x128xf32>
      %c2_i32 = arith.constant 2 : i32
      %116 = vector.broadcast %c2_i32 : i32 to vector<1x1x128xi32>
      %117 = arith.cmpi eq, %106, %116 : vector<1x1x128xi32>
      %118 = vector.broadcast %84 : f32 to vector<1x1x128xf32>
      %119 = arith.select %117, %118, %115 : vector<1x1x128xi1>, vector<1x1x128xf32>
      %c3_i32 = arith.constant 3 : i32
      %120 = vector.broadcast %c3_i32 : i32 to vector<1x1x128xi32>
      %121 = arith.cmpi eq, %106, %120 : vector<1x1x128xi32>
      %122 = vector.broadcast %90 : f32 to vector<1x1x128xf32>
      %123 = arith.select %121, %122, %119 : vector<1x1x128xi1>, vector<1x1x128xf32>
      %c4_i32 = arith.constant 4 : i32
      %124 = vector.broadcast %c4_i32 : i32 to vector<1x1x128xi32>
      %125 = arith.cmpi eq, %106, %124 : vector<1x1x128xi32>
      %126 = vector.broadcast %94 : f32 to vector<1x1x128xf32>
      %127 = arith.select %125, %126, %123 : vector<1x1x128xi1>, vector<1x1x128xf32>
      %c5_i32 = arith.constant 5 : i32
      %128 = vector.broadcast %c5_i32 : i32 to vector<1x1x128xi32>
      %129 = arith.cmpi eq, %106, %128 : vector<1x1x128xi32>
      %130 = vector.broadcast %99 : f32 to vector<1x1x128xf32>
      %131 = arith.select %129, %130, %127 : vector<1x1x128xi1>, vector<1x1x128xf32>
      %c6_i32 = arith.constant 6 : i32
      %132 = vector.broadcast %c6_i32 : i32 to vector<1x1x128xi32>
      %133 = arith.cmpi eq, %106, %132 : vector<1x1x128xi32>
      %134 = vector.broadcast %105 : f32 to vector<1x1x128xf32>
      %135 = arith.select %133, %134, %131 : vector<1x1x128xi1>, vector<1x1x128xf32>
      %c0_43 = arith.constant 0 : index
      %c0_44 = arith.constant 0 : index
      %c0_45 = arith.constant 0 : index
      %136 = vector.load %arg3[%c0_43, %c0_44, %c0_45] : memref<1x1x128xf32, #tpu.memory_space<vmem>>, vector<1x1x128xf32>
      tpu.vector_store %arg3[%c0_43, %c0_44, %c0_45], %135 {strides = array<i32>} : memref<1x1x128xf32, #tpu.memory_space<vmem>>, vector<1x1x128xf32>,
    } else {
    }
    return
  }
  func.func @transform_0(%arg0: i32, %arg1: i32) -> (i32, i32, i32) {
    %c1_i32 = arith.constant 1 : i32
    %0 = arith.muli %arg0, %c1_i32 : i32
    %1 = arith.addi %0, %arg1 : i32
    %c0_i32 = arith.constant 0 : i32
    %c0_i32_0 = arith.constant 0 : i32
    %c0_i32_1 = arith.constant 0 : i32
    return %1, %c0_i32, %c0_i32_0 : i32, i32, i32
  }
  func.func @transform_1(%arg0: i32, %arg1: i32) -> (i32, i32, i32) {
    %c0_i32 = arith.constant 0 : i32
    %c0_i32_0 = arith.constant 0 : i32
    %c0_i32_1 = arith.constant 0 : i32
    return %arg0, %c0_i32, %c0_i32_0 : i32, i32, i32
  }
}

</mosaic_0001>

<bundles_post_ra>
// kernel: tpu_custom_call.1
= control target key start
LH: loop header
LB: loop body
LE: loop exit
PB: predicated region body
PF: predicated region fallthrough
CT: control target
= control target key end

     0   :  { %6 = vsyncpa [#allocation6], 0  ;;  %s925_s0 = inlined_call_operand.vmem [shape: f32[2,7,512], index: 0, kind: input, shape index: {}]   ;;  %s926_s1 = inlined_call_operand.hbm [shape: f32[2,1,128], index: 1, kind: output, shape index: {}]  }
   0x1   :  { %8 = vsyncpa [#allocation6 + $0x1], 0  ;;  %s713_s6 = smov 0   ;;  %s715_s7 = smov 0  }
   0x2   :  { %s717_s8 = smov 0   ;;  %s719_s9 = smov 0  }
   0x3   :  { %s721_s10 = smov 0   ;;  %s723_s11 = smov 0  }
   0x4 LB: > { %s519_s12 = sadd.s32 4294967295, %s699_s11   ;;  %s520_s13 = sadd.s32 4294967294, %s699_s11   ;;  %s699_s11 = sphi %s723_s11, %s14_s11   ;;  %s695_s10 = sphi %s721_s10, %s933_s10   ;;  %s691_s9 = sphi %s719_s9, %s932_s9   ;;  %s687_s8 = sphi %s717_s8, %s931_s8   ;;  %s683_s7 = sphi %s715_s7, %s930_s7   ;;  %s679_s6 = sphi %s713_s6, %s929_s6  }
   0x5   : > { %s26_s14 = sadd.s32 1, %s695_s10  ;;  %s61_s15 = sadd.s32 1, %s687_s8 }
   0x6   : > { %p28_p0 = scmp.ge.s32.totalorder %s26_s14, 2  ;;  %p71_p1 = scmp.ne.s32.totalorder %s687_s8, %s683_s7 }
   0x7   : > { %p72_p2 = scmp.eq.s32.totalorder %s519_s12, 1  ;;  %p77_p3 = scmp.ne.s32.totalorder %s683_s7, %s679_s6 }
   0x8   : > { %s935_s14 = smov (%p28_p0, %s26_s14), 0  ;;  %p78_p5 = scmp.eq.s32.totalorder %s520_s13, 1 }
   0x9   : > { %p753_p4 = por %p72_p2, %p71_p1  ;;  %s58_s17 = ssub.s32 %s695_s10, %s935_s14 }
   0xa   : > { %p523_p6 = scmp.ge.s32.totalorder %s699_s11, 1  ;;  %p59_p7 = scmp.eq.s32.totalorder %s58_s17, 0 }
   0xb   : > { %p760_p8 = por %p78_p5, %p77_p3  ;;  %p106_p9 = scmp.lt.s32.totalorder %s699_s11, 3 }
   0xc   : > { %s766_s19 = scalar_select %p59_p7, %s687_s8, %s61_s15  }
   0xd   : > { %p107_p10 = pnand %p523_p6, %p106_p9 }
   0xe   : > { %p127_p11 = scmp.lt.s32.totalorder (!%p107_p10), %s691_s9, 1  ;;  %v141_v0 = vlaneseq (!%p107_p10)  ;;  %s526_s20 = sshll.u32 (!%p107_p10), %s691_s9, 9  ;;  %vm137_vm0 = vcmask (!%p107_p10), 5120   ;;  %v701_v1 = vmov (!%p107_p10), 0.0   ;;  %vm172_vm1 = vcmask (!%p107_p10), 1045504  }
   0xf   : > { %110 = sbr.rel (%p107_p10) target bundleno = 485 (0x1e5), region = 24  ;;  %139 = vst.msk [vmem:[#allocation3] sm:$0x3f] (!%p107_p10), %vm137_vm0, %v701_v1  ;;  %138 = vst.msk [vmem:[#allocation2] sm:$0x3f] (!%p107_p10), %vm137_vm0, %v701_v1  ;;  %v155_v4 = vstv (!%p107_p10), %s526_s20  ;;  %s124_s29 = sand.u32 (!%p107_p10), 1, %s683_s7  }
  0x10   : > { %140 = vst.msk [vmem:[#allocation4] sm:$0x3f] (!%p107_p10), %vm137_vm0, %v701_v1  ;;  %v774_v2 = vand.u32 (!%p107_p10), 127, %v141_v0  ;;  %v147_v3 = vshrl.u32 (!%p107_p10), %v141_v0, 7  ;;  %s531_s4 = sshll.u32 (!%p107_p10), %s691_s9, 4  ;;  %s125_s5 = scalar_lea.vmem (!%p107_p10), [#allocation5], %s124_s29 }
  0x11   : > { %s456_s12 = sshll.u32 (!%p107_p10), %s125_s5, 4  ;;  %s702_s23 = smov (!%p107_p10), [#allocation5]   ;;  %s880_s12 = int_to_ptr.vmem [resolvable:$true] %s456_s12 }
  0x12   : > { %v143_v5 = vadd.s32 (!%p107_p10), 128, %v774_v2  ;;  %v144_v6 = vadd.s32 (!%p107_p10), 256, %v774_v2  ;;  %v145_v7 = vadd.s32 (!%p107_p10), 384, %v774_v2  ;;  %v156_v8 = vadd.s32 (!%p107_p10), %v155_v4, %v774_v2  ;;  %s625_s24 = sshll.u32 (!%p107_p10), %s702_s23, 4  ;;  %s626_s24 = int_to_ptr.vmem [resolvable:$false] %s625_s24 }
  0x13   : > { %v255_v9 = vsub.s32 (!%p107_p10), 6, %v147_v3  ;;  %v783_v10 = vcvt.s32.f32 (!%p107_p10), %v147_v3  ;;  %vm421_vm10 = vcmp.eq.s32.totalorder (!%p107_p10), %v774_v2, 0  ;;  %vm424_vm11 = vcmp.eq.s32.totalorder (!%p107_p10), %v774_v2, 1  ;;  %p628_p1 = scmp.lt.s32.totalorder (!%p107_p10), %s880_s12, %s626_s24 }
  0x14   : > { %v157_v14 = vadd.s32 (!%p107_p10), %v155_v4, %v143_v5  ;;  %v158_v15 = vadd.s32 (!%p107_p10), %v155_v4, %v144_v6  ;;  %v159_v16 = vadd.s32 (!%p107_p10), %v155_v4, %v145_v7  ;;  %vm160_vm2 = vcmp.lt.s32.totalorder (!%p107_p10), %v156_v8, 8 }
  0x15   : > { %v795_v21 = vsel (!%p107_p10), %vm160_vm2, 1.0, %v701_v1  ;;  %vm427_vm12 = vcmp.eq.s32.totalorder (!%p107_p10), %v774_v2, 2  ;;  %vm430_vm13 = vcmp.eq.s32.totalorder (!%p107_p10), %v774_v2, 3  ;;  %vm433_vm14 = vcmp.eq.s32.totalorder (!%p107_p10), %v774_v2, 4 }
  0x16   : > { %s128_s21 = scalar_select %p127_p11, %s691_s9, 1  ;;  %vm161_vm3 = vcmp.lt.s32.totalorder %v157_v14, 8  ;;  %vm162_vm4 = vcmp.lt.s32.totalorder %v158_v15, 8  ;;  %vm163_vm5 = vcmp.lt.s32.totalorder %v159_v16, 8  ;;  %vm436_vm15 = vcmp.eq.s32.totalorder %v774_v2, 5 }
  0x17   : > { %v797_v22 = vsel %vm161_vm3, 1.0, %v701_v1  ;;  %v799_v23 = vsel %vm162_vm4, 1.0, %v701_v1  ;;  %v801_v24 = vsel %vm163_vm5, 1.0, %v701_v1  ;;  %s444_s9 = scalar_lea.sflag [#allocation6], %s124_s29 }
  0x18   : > { %s534_s22 = sshll.u32 %s128_s21, 5  ;;  %s878_s21 = scalar_lea.hbm %s926_s1, %s531_s4 }
  0x19   : > { %s131_s25 = scalar_lea.vmem %s925_s0, %s534_s22  ;;  %s621_s22 = scalar_lea.vmem %s880_s12, 16 }
  0x1a   : > { %v785_v11 = vld [vmem:[%s131_s25] sm:$0x7f]  ;;  %v152_v12 = vld [vmem:[%s131_s25 + $0x8] sm:$0x7f]  ;;  %v787_v13 = vld [vmem:[%s131_s25 + $0x10] sm:$0x7f]  ;;  %p622_p12 = scmp.ne.s32.totalorder %s880_s12, %s621_s22 }
  0x1b   : > { %v154_v17 = vld [vmem:[%s131_s25 + $0x18] sm:$0x7f]  ;;  %v180_v18 = vsel %vm172_vm1, %v152_v12, -inf  ;;  %v187_v19 = vsel %vm172_vm1, %v787_v13, -inf  ;;  %v793_v20 = vrot.slane %v785_v11, %v255_v9  ;;  %v804_v28 = vrot.slane %v152_v12, %v255_v9  ;;  %s627_s25 = scalar_lea.vmem %s626_s24, 32 }
  0x1c   : > { %v181_v25 = vrot.slane %v180_v18, 4  ;;  %v188_v26 = vrot.slane %v187_v19, 4  ;;  %v194_v27 = vsel %vm172_vm1, %v154_v17, -inf  ;;  %v807_v29 = vrot.slane %v787_v13, %v255_v9  ;;  %p623_p13 = pnand %p622_p12, %p753_p4  ;;  %p629_p2 = scmp.lt.s32.totalorder %s627_s25, %s621_s22 }
  0x1d   : > { %v195_v31 = vrot.slane %v194_v27, 4  ;;  %v809_v32 = vrot.slane %v154_v17, %v255_v9  ;;  %vm269_vm6 = vcmp.eq.f32.partialorder %v783_v10, %v793_v20  ;;  %vm270_vm7 = vcmp.eq.f32.partialorder %v783_v10, %v804_v28 }
  0x1e   : > { %v182_v30 = vmax.f32 %v180_v18, %v181_v25  ;;  %v189_v33 = vmax.f32 %v187_v19, %v188_v26  ;;  %vm271_vm8 = vcmp.eq.f32.partialorder %v783_v10, %v807_v29  ;;  %v273_v34 = vsel %vm269_vm6, %v795_v21, 0.0  ;;  %p624_p0 = pneg %p623_p13  ;;  %p630_p3 = por %p629_p2, %p628_p1 }
  0x1f   : > { %v196_v36 = vmax.f32 %v194_v27, %v195_v31  ;;  %vm272_vm9 = vcmp.eq.f32.partialorder %v783_v10, %v809_v32  ;;  %v274_v37 = vsel %vm270_vm7, %v797_v22, 0.0  ;;  %v275_v39 = vsel %vm271_vm8, %v799_v23, 0.0 }
  0x20   : > { %v183_v35 = vrot.slane %v182_v30, 2  ;;  %v190_v38 = vrot.slane %v189_v33, 2  ;;  %v276_v40 = vsel %vm272_vm9, %v801_v24, 0.0  ;;  %v315_v41 = vsel %vm172_vm1, %v273_v34, 0.0  ;;  %p631_p5 = pnand %p630_p3, %p624_p0 }
  0x21   : > { %v197_v43 = vrot.slane %v196_v36, 2  ;;  %v316_v44 = vsel %vm172_vm1, %v274_v37, 0.0  ;;  %v318_v45 = vsel %vm172_vm1, %v275_v39, 0.0  ;;  %v173_v48 = vsel %vm172_vm1, %v785_v11, -inf }
  0x22   : > { %v184_v42 = vmax.f32 %v182_v30, %v183_v35  ;;  %v191_v46 = vmax.f32 %v189_v33, %v190_v38  ;;  %v317_v47 = vadd.f32 %v316_v44, %v315_v41  ;;  %v320_v51 = vsel %vm172_vm1, %v276_v40, 0.0 }
  0x23   : > { %v198_v50 = vmax.f32 %v196_v36, %v197_v43  ;;  %v174_v52 = vrot.slane %v173_v48, 4 }
  0x24   : > { %v185_v49 = vrot.slane %v184_v42, 1  ;;  %v192_v53 = vrot.slane %v191_v46, 1  ;;  %v319_v54 = vadd.f32 %v318_v45, %v317_v47 }
  0x25   : > { %v199_v56 = vrot.slane %v198_v50, 1  ;;  %v175_v57 = vmax.f32 %v173_v48, %v174_v52 }
  0x26   : > { %v186_v55 = vmax.f32 %v184_v42, %v185_v49  ;;  %v193_v58 = vmax.f32 %v191_v46, %v192_v53  ;;  %v321_v59 = vadd.f32 %v320_v51, %v319_v54  ;;  %v278_v54 = vsub.f32 %v783_v10, %v804_v28 }
  0x27   : > { %v200_v60 = vmax.f32 %v198_v50, %v199_v56  ;;  %v176_v62 = vrot.slane %v175_v57, 2 }
  0x28   : > { %v202_v61 = vsub.f32 %v152_v12, %v186_v55  ;;  %v203_v63 = vsub.f32 %v787_v13, %v193_v58  ;;  %322 = vadd.xlane.f32.xlu1 %v321_v59  ;;  %v277_v58 = vsub.f32 %v783_v10, %v793_v20 }
  0x29   : > { %v204_v0 = vsub.f32 %v154_v17, %v200_v60  ;;  %v177_v3 = vmax.f32 %v175_v57, %v176_v62  ;;  %v279_v57 = vsub.f32 %v783_v10, %v807_v29  ;;  %v290_v62 = vmul.f32 %v278_v54, %v278_v54 }
  0x2a   : > { %v207_v1 = vmul.f32 1.442695, %v202_v61  ;;  %v209_v4 = vmul.f32 1.442695, %v203_v63  ;;  %v280_v61 = vsub.f32 %v783_v10, %v809_v32  ;;  %v289_v28 = vmul.f32 %v277_v58, %v277_v58 }
  0x2b   : > { %v211_v5 = vmul.f32 1.442695, %v204_v0  ;;  %v178_v6 = vrot.slane %v177_v3, 1  ;;  %v291_v63 = vmul.f32 %v279_v57, %v279_v57 }
  0x2c   : > { %605 = vpow2.f32 %v207_v1 }
  0x2d   : > { %607 = vpow2.f32 %v209_v4  ;;  %v179_v7 = vmax.f32 %v177_v3, %v178_v6  ;;  %v292_v3 = vmul.f32 %v280_v61, %v280_v61 }
  0x2e   : > { %609 = vpow2.f32 %v211_v5 }
  0x2f   : > { %v201_v8 = vsub.f32 %v785_v11, %v179_v7 }
  0x31   : > { %v205_v9 = vmul.f32 1.442695, %v201_v8 }
  0x33   : > { %611 = vpow2.f32 %v205_v9 }
  0x36   : > { %v606_v14 = vpop.eup %605 }
  0x37   : > { %v608_v12 = vpop.eup %607  ;;  %v220_v15 = vsel %vm172_vm1, %v606_v14, 0.0 }
  0x38   : > { %v610_v13 = vpop.eup %609  ;;  %v221_v16 = vrot.slane %v220_v15, 4  ;;  %v227_v17 = vsel %vm172_vm1, %v608_v12, 0.0 }
  0x39   : > { %v228_v18 = vrot.slane %v227_v17, 4  ;;  %v234_v19 = vsel %vm172_vm1, %v610_v13, 0.0 }
  0x3a   : > { %v222_v25 = vadd.f32 %v221_v16, %v220_v15  ;;  %v235_v26 = vrot.slane %v234_v19, 4 }
  0x3b   : > { %v229_v27 = vadd.f32 %v228_v18, %v227_v17 }
  0x3c   : > { %v223_v30 = vrot.slane %v222_v25, 2  ;;  %v236_v31 = vadd.f32 %v235_v26, %v234_v19 }
  0x3d   : > { %v230_v33 = vrot.slane %v229_v27, 2  ;;  %v612_v11 = vpop.eup %611 }
  0x3e   : > { %v224_v34 = vadd.f32 %v223_v30, %v222_v25  ;;  %v237_v35 = vrot.slane %v236_v31, 2  ;;  %v213_v37 = vsel %vm172_vm1, %v612_v11, 0.0  ;;  %v314_v25 = vld [vmem:[#allocation3] sm:$0x3f] }
  0x3f   : > { %v231_v36 = vadd.f32 %v230_v33, %v229_v27  ;;  %v214_v40 = vrot.slane %v213_v37, 4  ;;  %v326_v33 = vld [vmem:[#allocation4] sm:$0x3f] }
  0x40   : > { %v225_v38 = vrot.slane %v224_v34, 1  ;;  %v238_v39 = vadd.f32 %v237_v35, %v236_v31  ;;  %v301_v35 = vld [vmem:[#allocation2] sm:$0x3f] }
  0x41   : > { %v232_v41 = vrot.slane %v231_v36, 1  ;;  %v215_v44 = vadd.f32 %v214_v40, %v213_v37 }
  0x42   : > { %v226_v42 = vadd.f32 %v225_v38, %v224_v34  ;;  %v239_v43 = vrot.slane %v238_v39, 1  ;;  %v341_v38 = vmul.f32 0.2, %v783_v10 }
  0x43   : > { %v233_v45 = vadd.f32 %v232_v41, %v231_v36  ;;  %v216_v47 = vrot.slane %v215_v44, 2 }
  0x44   : > { %v240_v46 = vadd.f32 %v239_v43, %v238_v39  ;;  %613 = vrcp.f32 %v226_v42  ;;  %v377_v41 = vmul.f32 %v341_v38, %v341_v38 }
  0x45   : > { %615 = vrcp.f32 %v233_v45  ;;  %v217_v48 = vadd.f32 %v216_v47, %v215_v44 }
  0x46   : > { %617 = vrcp.f32 %v240_v46 }
  0x47   : > { %v218_v49 = vrot.slane %v217_v48, 1 }
  0x49   : > { %v219_v50 = vadd.f32 %v218_v49, %v217_v48 }
  0x4b   : > { %619 = vrcp.f32 %v219_v50 }
  0x4e   : > { %v614_v51 = vpop.eup %613 }
  0x4f   : > { %v616_v52 = vpop.eup %615  ;;  %v244_v53 = vmul.f32 %v614_v51, %v797_v22 }
  0x50   : > { %v618_v55 = vpop.eup %617  ;;  %v246_v56 = vmul.f32 %v616_v52, %v799_v23 }
  0x51   : > { %v248_v59 = vmul.f32 %v618_v55, %v801_v24  ;;  %v250_v60 = vmul.f32 %v606_v14, %v244_v53 }
  0x52   : > { %v251_v22 = vmul.f32 %v608_v12, %v246_v56 }
  0x53   : > { %v252_v23 = vmul.f32 %v610_v13, %v248_v59  ;;  %v294_v4 = vmul.f32 %v290_v62, %v250_v60  ;;  %v303_v20 = vsel %vm172_vm1, %v250_v60, 0.0 }
  0x54   : > { %v295_v5 = vmul.f32 %v291_v63, %v251_v22 }
  0x55   : > { %v620_v0 = vpop.eup %619  ;;  %v296_v24 = vmul.f32 %v292_v3, %v252_v23  ;;  %v328_v7 = vsel %vm172_vm1, %v294_v4, 0.0  ;;  %v307_v17 = vsel %vm172_vm1, %v252_v23, 0.0 }
  0x56   : > { %v242_v1 = vmul.f32 %v620_v0, %v795_v21  ;;  %v330_v14 = vsel %vm172_vm1, %v295_v5, 0.0  ;;  %v305_v21 = vsel %vm172_vm1, %v251_v22, 0.0 }
  0x57   : > { %v332_v15 = vsel %vm172_vm1, %v296_v24, 0.0 }
  0x58   : > { %v249_v29 = vmul.f32 %v612_v11, %v242_v1 }
  0x5a   : > { %v293_v6 = vmul.f32 %v289_v28, %v249_v29  ;;  %v302_v32 = vsel %vm172_vm1, %v249_v29, 0.0 }
  0x5b   : > { %v304_v8 = vadd.f32 %v303_v20, %v302_v32 }
  0x5c   : > { %v327_v9 = vsel %vm172_vm1, %v293_v6, 0.0 }
  0x5d   : > { %v329_v12 = vadd.f32 %v328_v7, %v327_v9  ;;  %v306_v16 = vadd.f32 %v305_v21, %v304_v8 }
  0x5f   : > { %v331_v13 = vadd.f32 %v330_v14, %v329_v12  ;;  %v308_v19 = vadd.f32 %v307_v17, %v306_v16 }
  0x61   : > { %v333_v18 = vadd.f32 %v332_v15, %v331_v13 }
  0x63   : > { %334 = vadd.xlane.f32.xlu0 %v333_v18 }
  0x67   : > { %309 = vadd.xlane.f32.xlu0 %v308_v19 }
  0xb5   : > { %v323_v26 = vpop.xlane.xlu1 %322 }
  0xb6   : > { %v324_v27 = vadd.f32 %v323_v26, %v314_v25 }
  0xb8   : > { %325 = vst.msk [vmem:[#allocation3] sm:$0x3f] %vm137_vm0, %v324_v27 }
  0xbf   : > { %v343_v30 = vld [vmem:[#allocation3] sm:$0x3f] }
  0xc0   : > { %v389_v31 = vsel %vm137_vm0, %v343_v30, 0.0  ;;  %v410_v47 = vmul.f32 %v377_v41, %v343_v30  ;;  %v399_v49 = vmul.f32 %v343_v30, %v341_v38 }
  0xc1   : > { %390 = vadd.xlane.f32.xlu1 %v389_v31 }
  0xc2   : > { %v411_v10 = vsel %vm137_vm0, %v410_v47, 0.0  ;;  %v400_v50 = vsel %vm137_vm0, %v399_v49, 0.0 }
  0xf0   : > { %v335_v11 = vpop.xlane.xlu0 %334 }
  0xf1   : > { %v336_v34 = vadd.f32 %v335_v11, %v326_v33 }
  0xf3   : > { %337 = vst.msk [vmem:[#allocation4] sm:$0x3f] %vm137_vm0, %v336_v34 }
  0xf4   : > { %v310_v36 = vpop.xlane.xlu0 %309 }
  0xf5   : > { %v311_v37 = vadd.f32 %v310_v36, %v301_v35 }
  0xf7   : > { %313 = vst.msk [vmem:[#allocation2] sm:$0x3f] %vm137_vm0, %v311_v37 }
  0xfa   : > { %v344_v39 = vld [vmem:[#allocation4] sm:$0x3f] }
  0xfb   : > { %v345_v40 = vsel %vm137_vm0, %v344_v39, 0.0 }
  0xfc   : > { %346 = vadd.xlane.f32.xlu1 %v345_v40 }
  0xfe   : > { %v342_v42 = vld [vmem:[#allocation2] sm:$0x3f] }
  0xff   : > { %v356_v43 = vsel %vm137_vm0, %v342_v42, 0.0  ;;  %v366_v44 = vmul.f32 %v342_v42, %v341_v38  ;;  %v378_v45 = vmul.f32 %v377_v41, %v342_v42 }
 0x100   : > { %357 = vadd.xlane.f32.xlu0 %v356_v43 }
 0x101   : > { %v367_v46 = vsel %vm137_vm0, %v366_v44, 0.0  ;;  %v379_v48 = vsel %vm137_vm0, %v378_v45, 0.0  ;;  %vm439_vm0 = vcmp.eq.s32.totalorder %v774_v2, 6 }
 0x102   : > { %368 = vadd.xlane.f32.xlu1 %v367_v46 }
 0x104   : > { %380 = vadd.xlane.f32.xlu0 %v379_v48 }
 0x106   : > { %412 = vadd.xlane.f32.xlu1 %v411_v10 }
 0x108   : > { %401 = vadd.xlane.f32.xlu0 %v400_v50 }
 0x14e   : > { %v391_v51 = vpop.xlane.xlu1 %390 }
 0x14f   : > { %v392_v52 = vrot.slane %v391_v51, 4 }
 0x151   : > { %v393_v56 = vadd.f32 %v392_v52, %v391_v51 }
 0x153   : > { %v394_v63 = vrot.slane %v393_v56, 2 }
 0x155   : > { %v395_v32 = vadd.f32 %v394_v63, %v393_v56 }
 0x157   : > { %v396_v19 = vrot.slane %v395_v32, 1 }
 0x159   : > { %v397_v11 = vadd.f32 %v396_v19, %v395_v32 }
 0x189   : > { %v347_v53 = vpop.xlane.xlu1 %346 }
 0x18a   : > { %v348_v54 = vrot.slane %v347_v53, 4 }
 0x18c   : > { %v349_v55 = vadd.f32 %v348_v54, %v347_v53 }
 0x18d   : > { %v358_v57 = vpop.xlane.xlu0 %357 }
 0x18e   : > { %v350_v58 = vrot.slane %v349_v55, 2  ;;  %v359_v59 = vrot.slane %v358_v57, 4 }
 0x18f   : > { %v369_v60 = vpop.xlane.xlu1 %368 }
 0x190   : > { %v360_v61 = vadd.f32 %v359_v59, %v358_v57  ;;  %v370_v62 = vrot.slane %v369_v60, 4  ;;  %v351_v22 = vadd.f32 %v350_v58, %v349_v55 }
 0x191   : > { %v381_v0 = vpop.xlane.xlu0 %380 }
 0x192   : > { %v361_v28 = vrot.slane %v360_v61, 2  ;;  %v371_v1 = vadd.f32 %v370_v62, %v369_v60  ;;  %v382_v23 = vrot.slane %v381_v0, 4  ;;  %v352_v3 = vrot.slane %v351_v22, 1 }
 0x193   : > { %v413_v4 = vpop.xlane.xlu1 %412 }
 0x194   : > { %v372_v29 = vrot.slane %v371_v1, 2  ;;  %v383_v5 = vadd.f32 %v382_v23, %v381_v0  ;;  %v414_v20 = vrot.slane %v413_v4, 4  ;;  %v353_v6 = vadd.f32 %v352_v3, %v351_v22 }
 0x195   : > { %v402_v24 = vpop.xlane.xlu0 %401  ;;  %v362_v7 = vadd.f32 %v361_v28, %v360_v61 }
 0x196   : > { %v384_v8 = vrot.slane %v383_v5, 2  ;;  %v415_v9 = vadd.f32 %v414_v20, %v413_v4  ;;  %v403_v14 = vrot.slane %v402_v24, 4  ;;  %535 = vpush %v353_v6  ;;  %v373_v21 = vadd.f32 %v372_v29, %v371_v1 }
 0x197   : > { %v363_v12 = vrot.slane %v362_v7, 1 }
 0x198   : > { %v416_v15 = vrot.slane %v415_v9, 2  ;;  %v404_v13 = vadd.f32 %v403_v14, %v402_v24  ;;  %v374_v16 = vrot.slane %v373_v21, 1  ;;  %v385_v17 = vadd.f32 %v384_v8, %v383_v5 }
 0x199   : > { %v364_v18 = vadd.f32 %v363_v12, %v362_v7 }
 0x19a   : > { %v417_v25 = vadd.f32 %v416_v15, %v415_v9  ;;  %v405_v26 = vrot.slane %v404_v13, 2  ;;  %v375_v27 = vadd.f32 %v374_v16, %v373_v21  ;;  %v386_v30 = vrot.slane %v385_v17, 1 }
 0x19b   : > { %537 = vpush %v364_v18 }
 0x19c   : > { %v406_v31 = vadd.f32 %v405_v26, %v404_v13  ;;  %539 = vpush %v375_v27  ;;  %v387_v33 = vadd.f32 %v386_v30, %v385_v17  ;;  %v418_v34 = vrot.slane %v417_v25, 1 }
 0x19e   : > { %541 = vpush %v387_v33  ;;  %v407_v35 = vrot.slane %v406_v31, 1  ;;  %v419_v37 = vadd.f32 %v418_v34, %v417_v25 }
 0x19f   : > { %543 = vpush %v397_v11 }
 0x1a0   : > { %v408_v36 = vadd.f32 %v407_v35, %v406_v31 }
 0x1a2   : > { %545 = vpush %v408_v36 }
 0x1a3   : > { %547 = vpush %v419_v37 }
 0x1c7   : > { %s536_s26 = spop %535 }
 0x1c8   : > { %s355_s27 = smul.f32 0.04, %s536_s26 }
 0x1ca   : > { %v422_v38 = vstv %s355_s27 }
 0x1cb   : > { %v423_v39 = vsel %vm421_vm10, %v422_v38, 0.0 }
 0x1cc   : > { %s538_s28 = spop %537 }
 0x1cd   : > { %v425_v40 = vstv %s538_s28  ;;  %s540_s30 = spop %539 }
 0x1ce   : > { %v426_v41 = vsel %vm424_vm11, %v425_v40, %v423_v39  ;;  %v428_v42 = vstv %s540_s30 }
 0x1cf   : > { %v429_v43 = vsel %vm427_vm12, %v428_v42, %v426_v41  ;;  %s542_s2 = spop %541 }
 0x1d0   : > { %v431_v44 = vstv %s542_s2  ;;  %s544_s3 = spop %543 }
 0x1d1   : > { %v432_v45 = vsel %vm430_vm13, %v431_v44, %v429_v43  ;;  %v434_v46 = vstv %s544_s3 }
 0x1d2   : > { %v435_v47 = vsel %vm433_vm14, %v434_v46, %v432_v45 }
 0x1d3   : > { %s546_s13 = spop %545 }
 0x1d4   : > { %v437_v48 = vstv %s546_s13  ;;  %s548_s15 = spop %547 }
 0x1d5   : > { %v438_v49 = vsel %vm436_vm15, %v437_v48, %v435_v47  ;;  %v440_v10 = vstv %s548_s15 }
 0x1d6   : > { %v441_v50 = vsel %vm439_vm0, %v440_v10, %v438_v49 }
 0x1d7   : > { %442 = vst [vmem:[%s125_s5] sm:$0x1] %v441_v50 }
 0x1d8   : > { %634 = shalt.err (!%p631_p5)
}
 0x1d9   : > { %s635_s26 = scalar_lea.hbm %s878_s21, 16  ;;  %s639_s29 = scalar_lea.hbm %s926_s1, 32 }
 0x1da   : > { %p636_p6 = scmp.ne.s32.totalorder %s878_s21, %s635_s26  ;;  %p640_p10 = scmp.lt.u32.totalorder %s878_s21, %s926_s1 }
 0x1db   : > { %p641_p11 = scmp.lt.u32.totalorder %s639_s29, %s635_s26  ;;  %p643_p13 = scmp.lt.u32.totalorder %s635_s26, %s878_s21 }
 0x1dc   : > { %p637_p7 = pnand %p636_p6, %p753_p4 }
 0x1dd   : > { %p642_p12 = por %p641_p11, %p640_p10 }
 0x1de   : > { %p638_p9 = pneg %p637_p7 }
 0x1df   : > { %p644_p0 = por %p643_p13, %p642_p12 }
 0x1e1   : > { %p645_p1 = pnand %p644_p0, %p638_p9 }
 0x1e3   : > { %648 = shalt.err (!%p645_p1)
}
 0x1e4   : > { %549 = dma.vmem_to_hbm [thread:$0]  (%p753_p4), %s880_s12, 16, %s878_s21, %s444_s9  }
 0x1e5 PF: > { %p555_p2 = scmp.ge.s32.totalorder %s699_s11, 2  ;;  %s468_s3 = sand.u32 1, %s679_s6  }
 0x1e6   : > { %s469_s4 = scalar_lea.sflag [#allocation6], %s468_s3 }
 0x1e7   : > { %p552_p3 = pnand %p555_p2, %p760_p8 }
 0x1e9   : > { %674 = dma.done.wait (!%p552_p3), %s469_s4, 16  }
 0x1ea   : > { %676 = vsyncadd (!%p552_p3), %s469_s4, 4294967280  ;;  %s14_s11 = sadd.s32 1, %s699_s11   ;;  %s929_s6 = smov %s683_s7 }
 0x1eb   : > { %p11_p5 = scmp.ge.s32.totalorder %s14_s11, 4   ;;  %s930_s7 = smov %s687_s8 }
 0x1ec   : > { %s931_s8 = smov %s766_s19  ;;  %s932_s9 = smov %s695_s10 }
 0x1ed   : > { %s933_s10 = smov %s935_s14  ;;  %13 = sbr.rel (!%p11_p5) target bundleno = 4 (0x4), region = 67 }
 0x1f4   :  { %473 = vsyncpa [#allocation6], 1 }
 0x1f5   :  { %475 = vsyncpa [#allocation6 + $0x1], 1 }

</bundles_post_ra>
